<compile_context>
chip_gen: v5e
topology: v5e:2x2
jax: 0.10.0
libtpu: 0.0.40
codegen_flags: <defaults>
</compile_context>

<pallas_src>
import functools

import jax
import jax.numpy as jnp
from jax.experimental import pallas as pl
from jax.experimental.pallas import tpu as pltpu


def _round_up(a, b):
    return ((a + b - 1) // b) * b


def _sampler_kernel(x_ref, wcat_ref, eps_ref, out_ref, *, feature_size):
    """Fused: one wide GEMM + reparameterization + KLD for one row tile."""
    # [TM, in] @ [in, 2F] -> [TM, 2F], f32 accumulation on the MXU.
    mm = jnp.dot(x_ref[...], wcat_ref[...], preferred_element_type=jnp.float32)
    mu = mm[:, :feature_size]
    logvar = mm[:, feature_size:]

    std = jnp.exp(0.5 * logvar)                 # single EUP transcendental
    eps = eps_ref[...].astype(jnp.float32)
    sample = eps * std + mu
    # exp(logvar) == std * std  (VPU mul instead of a second exp)
    kld = -(mu * mu + std * std) + 1.0 + logvar

    # Two static-slice stores; no lane-axis concatenate inside the kernel.
    out_ref[:, :feature_size] = sample.astype(out_ref.dtype)
    out_ref[:, feature_size:] = kld.astype(out_ref.dtype)


def part_feat_sampler(x, w_mu, w_var, eps, *, probabilistic=True,
                      row_tile=1024, mxu_dtype=jnp.bfloat16):
    """x: [N, in_size]; w_mu/w_var: [feature_size, in_size] (PyTorch layout);
    eps: [N, feature_size].  Returns [N, 2*feature_size] (prob) or [N, feature_size]."""
    N, in_size = x.shape
    feature_size = w_mu.shape[0]
    out_dtype = x.dtype

    if not probabilistic:
        # Single small GEMM: XLA already hits roofline here; a Pallas call would
        # only add masked 64-lane stores + per-call overhead (perf review).
        return jnp.dot(x, w_mu.T,
                       preferred_element_type=jnp.float32).astype(out_dtype)

    if mxu_dtype is None:
        mxu_dtype = x.dtype
    mxu_dtype = jnp.dtype(mxu_dtype)
    two_f = 2 * feature_size

    # Fuse the two weight matrices into one [in_size, 2F] MXU operand.
    # Under jit this transpose+concat+cast runs once (folded for constants).
    wcat = jnp.concatenate([w_mu.T, w_var.T], axis=1).astype(mxu_dtype)
    x_in = x.astype(mxu_dtype)

    # Row tiling: large tiles amortize the ~0.35us/step grid cost; aim for >=4
    # grid steps so v7x megacore can shard rows over both TensorCores.
    # tm is a multiple of 8 (sublane); the tail block is handled via cdiv.
    tm = min(int(row_tile), max(8, _round_up(pl.cdiv(N, 4), 8)))
    grid = (pl.cdiv(N, tm),)

    in_bytes = mxu_dtype.itemsize
    eps_bytes = jnp.dtype(eps.dtype).itemsize
    out_bytes = jnp.dtype(out_dtype).itemsize

    # Explicit VMEM budget: double-buffered x/eps/out tiles + single-buffered
    # resident weights, with 2x headroom, kept well under v7x's 64 MiB.
    vmem_needed = (2 * tm * in_size * in_bytes
                   + 2 * tm * feature_size * eps_bytes
                   + 2 * tm * two_f * out_bytes
                   + in_size * two_f * in_bytes)
    vmem_limit = int(min(max(2 * vmem_needed, 32 << 20), 48 << 20))

    params = pltpu.CompilerParams(dimension_semantics=("parallel",),
                                  vmem_limit_bytes=vmem_limit)

    cost = pl.CostEstimate(
        flops=2 * N * in_size * two_f,
        transcendentals=N * feature_size,   # one exp per (row, feature)
        bytes_accessed=(N * in_size * in_bytes + in_size * two_f * in_bytes
                        + N * feature_size * eps_bytes + N * two_f * out_bytes),
    )

    # Weights have a constant block index -> single-buffer them (halves their
    # VMEM footprint; matters when in_size is large on v7x's 64 MiB VMEM).
    try:
        w_spec = pl.BlockSpec((in_size, two_f), lambda i: (0, 0),
                              pipeline_mode=pl.Buffered(1))
    except TypeError:  # older jax without pipeline_mode: fall back to default
        w_spec = pl.BlockSpec((in_size, two_f), lambda i: (0, 0))

    kernel = functools.partial(_sampler_kernel, feature_size=feature_size)
    return pl.pallas_call(
        kernel,
        out_shape=jax.ShapeDtypeStruct((N, two_f), out_dtype),
        grid=grid,
        in_specs=[
            pl.BlockSpec((tm, in_size), lambda i: (i, 0)),        # x row tile
            w_spec,                                               # fused weights (resident)
            pl.BlockSpec((tm, feature_size), lambda i: (i, 0)),   # eps row tile
        ],
        out_specs=pl.BlockSpec((tm, two_f), lambda i: (i, 0)),
        compiler_params=params,
        cost_estimate=cost,
    )(x_in, wcat, eps)


def _reference(x, w_mu, w_var, eps, probabilistic=True, mxu_dtype=None):
    if mxu_dtype is None:
        mu = x @ w_mu.T
        logvar = x @ w_var.T
    else:
        xq = x.astype(mxu_dtype)
        mu = jnp.dot(xq, w_mu.T.astype(mxu_dtype),
                     preferred_element_type=jnp.float32)
        logvar = jnp.dot(xq, w_var.T.astype(mxu_dtype),
                         preferred_element_type=jnp.float32)
    if not probabilistic:
        return mu.astype(x.dtype)
    std = jnp.exp(0.5 * logvar)
    sample = eps * std + mu
    kld = -(mu * mu + jnp.exp(logvar)) + 1.0 + logvar
    return jnp.concatenate([sample, kld], axis=1).astype(x.dtype)


if __name__ == "__main__":
    # Small shapes consistent with the module: x [N, in_size] -> Linear(in_size, feature_size)
    N, in_size, feature_size = 8, 32, 64

    key = jax.random.PRNGKey(0)
    kx, kmu, kvar, keps = jax.random.split(key, 4)

    x = jax.random.normal(kx, (N, in_size), dtype=jnp.float32)
    # Deterministic parameter init (PyTorch Linear weight shape: [out, in], bias=False).
    bound = 1.0 / (in_size ** 0.5)
    w_mu = jax.random.uniform(kmu, (feature_size, in_size),
                              minval=-bound, maxval=bound, dtype=jnp.float32)
    w_var = jax.random.uniform(kvar, (feature_size, in_size),
                               minval=-bound, maxval=bound, dtype=jnp.float32)
    # eps ~ randn_like(std), generated deterministically outside the kernel.
    eps = jax.random.normal(keps, (N, feature_size), dtype=jnp.float32)

    sampler = jax.jit(part_feat_sampler,
                      static_argnames=("probabilistic", "row_tile", "mxu_dtype"))

    # Default path: bf16 MXU feed (halves HBM traffic on this mem-bound kernel).
    out_bf16 = jax.block_until_ready(sampler(x, w_mu, w_var, eps))
    assert out_bf16.shape == (N, 2 * feature_size)
    ref_bf16 = _reference(x, w_mu, w_var, eps, True, mxu_dtype=jnp.bfloat16)
    assert jnp.allclose(out_bf16, ref_bf16, atol=2e-3, rtol=2e-3), "bf16 path mismatch"
    # Still close to the exact f32 module semantics (bf16 operand rounding only).
    ref_f32 = _reference(x, w_mu, w_var, eps, True)
    assert jnp.allclose(out_bf16, ref_f32, atol=5e-1, rtol=2e-1), "bf16 vs f32 drift"

    # Exact f32 path (mxu_dtype=None): bitwise-faithful to the module math.
    out_f32 = jax.block_until_ready(sampler(x, w_mu, w_var, eps, mxu_dtype=None))
    assert jnp.allclose(out_f32, ref_f32, atol=1e-5, rtol=1e-5), "f32 path mismatch"

    # Non-probabilistic path (plain XLA GEMM, per perf review).
    out_mu = jax.block_until_ready(
        sampler(x, w_mu, w_var, eps, probabilistic=False))
    assert jnp.allclose(out_mu, _reference(x, w_mu, w_var, eps, False),
                        atol=1e-5, rtol=1e-5), "mu path mismatch"

    print("KERNEL_OK")
</pallas_src>

<mosaic_0001>
module attributes {stable_mosaic.version = 11 : i64} {
  func.func @_sampler_kernel(%arg0: i32, %arg1: memref<8x32xbf16, #tpu.memory_space<vmem>>, %arg2: memref<32x128xbf16, #tpu.memory_space<vmem>>, %arg3: memref<8x64xf32, #tpu.memory_space<vmem>>, %arg4: memref<8x128xf32, #tpu.memory_space<vmem>>) attributes {dimension_semantics = [#tpu.dimension_semantics<parallel>], iteration_bounds = array<i64: 1>, scalar_prefetch = 0 : i64, scratch_operands = 0 : i64, tpu.core_type = #tpu.core_type<tc>, window_params = [{transform_indices = @transform_0, window_bounds = array<i64: 8, 32>}, {pipeline_mode = #tpu.pipeline_mode<synchronous>, transform_indices = @transform_1, window_bounds = array<i64: 32, 128>}, {transform_indices = @transform_2, window_bounds = array<i64: 8, 64>}, {transform_indices = @transform_3, window_bounds = array<i64: 8, 128>}]} {
    %c0 = arith.constant 0 : index
    %c0_0 = arith.constant 0 : index
    %0 = vector.load %arg1[%c0, %c0_0] : memref<8x32xbf16, #tpu.memory_space<vmem>>, vector<8x32xbf16>
    %c0_1 = arith.constant 0 : index
    %c0_2 = arith.constant 0 : index
    %1 = vector.load %arg2[%c0_1, %c0_2] : memref<32x128xbf16, #tpu.memory_space<vmem>>, vector<32x128xbf16>
    %cst = arith.constant dense<0.000000e+00> : vector<8x128xf32>
    %2 = tpu.matmul %0, %1, %cst {dimension_numbers = #tpu.dot_dimension_numbers<[1], [0], [0], [1], [0, 0, 1, 1], [], []>} : vector<8x32xbf16>, vector<32x128xbf16>, vector<8x128xf32> -> vector<8x128xf32>
    %3 = vector.extract_strided_slice %2 {offsets = [0, 0], sizes = [8, 64], strides = [1, 1]} : vector<8x128xf32> to vector<8x64xf32>
    %4 = vector.extract_strided_slice %2 {offsets = [0, 64], sizes = [8, 64], strides = [1, 1]} : vector<8x128xf32> to vector<8x64xf32>
    %cst_3 = arith.constant 5.000000e-01 : f32
    %5 = vector.broadcast %cst_3 : f32 to vector<8x64xf32>
    %6 = arith.mulf %5, %4 : vector<8x64xf32>
    %7 = math.exp %6 : vector<8x64xf32>
    %c0_4 = arith.constant 0 : index
    %c0_5 = arith.constant 0 : index
    %8 = vector.load %arg3[%c0_4, %c0_5] : memref<8x64xf32, #tpu.memory_space<vmem>>, vector<8x64xf32>
    %9 = arith.mulf %8, %7 : vector<8x64xf32>
    %10 = arith.addf %9, %3 : vector<8x64xf32>
    %11 = arith.mulf %3, %3 : vector<8x64xf32>
    %12 = arith.mulf %7, %7 : vector<8x64xf32>
    %13 = arith.addf %11, %12 : vector<8x64xf32>
    %cst_6 = arith.constant 0.000000e+00 : f32
    %14 = vector.broadcast %cst_6 : f32 to vector<8x64xf32>
    %15 = arith.subf %14, %13 : vector<8x64xf32>
    %cst_7 = arith.constant 1.000000e+00 : f32
    %16 = vector.broadcast %cst_7 : f32 to vector<8x64xf32>
    %17 = arith.addf %15, %16 : vector<8x64xf32>
    %18 = arith.addf %17, %4 : vector<8x64xf32>
    %c0_8 = arith.constant 0 : index
    %c0_9 = arith.constant 0 : index
    %19 = vector.load %arg4[%c0_8, %c0_9] : memref<8x128xf32, #tpu.memory_space<vmem>>, vector<8x64xf32>
    tpu.vector_store %arg4[%c0_8, %c0_9], %10 {strides = array<i32>} : memref<8x128xf32, #tpu.memory_space<vmem>>, vector<8x64xf32>,
    %c0_10 = arith.constant 0 : index
    %c64 = arith.constant 64 : index
    %20 = vector.load %arg4[%c0_10, %c64] : memref<8x128xf32, #tpu.memory_space<vmem>>, vector<8x64xf32>
    tpu.vector_store %arg4[%c0_10, %c64], %18 {strides = array<i32>} : memref<8x128xf32, #tpu.memory_space<vmem>>, vector<8x64xf32>,
    return
  }
  func.func @transform_0(%arg0: i32) -> (i32, i32) {
    %c0_i32 = arith.constant 0 : i32
    %c0_i32_0 = arith.constant 0 : i32
    return %arg0, %c0_i32 : i32, i32
  }
  func.func @transform_1(%arg0: i32) -> (i32, i32) {
    %c0_i32 = arith.constant 0 : i32
    %c0_i32_0 = arith.constant 0 : i32
    %c0_i32_1 = arith.constant 0 : i32
    return %c0_i32, %c0_i32_0 : i32, i32
  }
  func.func @transform_2(%arg0: i32) -> (i32, i32) {
    %c0_i32 = arith.constant 0 : i32
    %c0_i32_0 = arith.constant 0 : i32
    return %arg0, %c0_i32 : i32, i32
  }
  func.func @transform_3(%arg0: i32) -> (i32, i32) {
    %c0_i32 = arith.constant 0 : i32
    %c0_i32_0 = arith.constant 0 : i32
    return %arg0, %c0_i32 : i32, i32
  }
}

</mosaic_0001>

<bundles_post_ra>
// kernel: part_feat_sampler.1
= control target key start
LH: loop header
LB: loop body
LE: loop exit
PB: predicated region body
PF: predicated region fallthrough
CT: control target
= control target key end

     0   :  { %s176_s0 = inlined_call_operand.vmem [shape: bf16[8,32], index: 0, kind: input, shape index: {}]   ;;  %s177_s1 = inlined_call_operand.vmem [shape: bf16[32,128], index: 1, kind: input, shape index: {}]   ;;  %s178_s2 = inlined_call_operand.vmem [shape: f32[8,64], index: 2, kind: input, shape index: {}]   ;;  %s179_s3 = inlined_call_operand.hbm [shape: f32[8,128], index: 3, kind: output, shape index: {}]  }
   0x1   :  { %v108_v0 = vld [vmem:[%s177_s1 + $0x8] sm:$0xff] }
   0x2   :  { %8 = vsyncpa [#allocation3], 0  ;;  %43 = vmatpush.bf16.msra.mxu0 %v108_v0  ;;  %v107_v1 = vld [vmem:[%s177_s1] sm:$0xff]  ;;  %vm33_vm0 = vcmask 261120   ;;  %s139_s18 = smov 64   ;;  %vm74_vm1 = vcmask 523264  }
   0x3   :  { %v16_v2 = vld [vmem:[%s176_s0] sm:$0xf]  ;;  %s140_s0 = smov [#allocation2]   ;;  %s89_s23 = sshll.u32 %s179_s3, 4  ;;  %vm80_vm2 = vcmask 1048064   ;;  %s90_s23 = int_to_ptr.hbm [resolvable:$true] %s89_s23 }
   0x4   :  { %v53_v9 = vld [vmem:[%s178_s2] sm:$0xff]  ;;  %s87_s20 = sshll.u32 %s140_s0, 4  ;;  %s88_s20 = int_to_ptr.vmem [resolvable:$true] %s87_s20 }
   0x6   :  { %44 = vmatpush.bf16.msra.mxu0 %v107_v1 }
   0x9   :  { %106 = vmatmul.msk.bf16.vlgmr.msra.gmra.mxu0 %vm33_vm0, %v16_v2 }
  0x86   :  { %v46_v3 = vpop.f32.mrf.mxu0 }
  0x87   :  { %v50_v4 = vmul.f32 0.5, %v46_v3  ;;  %v60_v12 = vmul.f32 %v46_v3, %v46_v3 }
  0x89   :  { %v51_v5 = vmul.f32 1.442695, %v50_v4 }
  0x8b   :  { %111 = vpow2.f32 %v51_v5 }
  0x8e   :  { %v48_v6 = vpop.f32.mrf.mxu0 }
  0x91   :  { %v112_v7 = vpop.eup %111 }
  0x92   :  { %55 = vrot.lane.b32.xlu1 %v112_v7, %s139_s18  ;;  %v61_v8 = vmul.f32 %v112_v7, %v112_v7 }
  0x94   :  { %63 = vrot.lane.b32.xlu0 %v61_v8, %s139_s18 }
  0x9c   :  { %70 = vrot.lane.b32.xlu0 %v46_v3, %s139_s18 }
 0x104   :  { %v56_v10 = vpop.permute.xlu1 %55 }
 0x105   :  { %v58_v11 = vmul.f32 %v56_v10, %v53_v9 }
 0x106   :  { %v64_v13 = vpop.permute.xlu0 %63 }
 0x107   :  { %v59_v14 = vadd.f32 %v58_v11, %v46_v3  ;;  %v66_v15 = vadd.f32 %v64_v13, %v60_v12 }
 0x109   :  { %v67_v16 = vsub.f32 0.0, %v66_v15  ;;  %75 = vst.msk [vmem:[#allocation2] sm:$0xff] %vm74_vm1, %v59_v14 }
 0x10b   :  { %v68_v17 = vadd.f32 1.0, %v67_v16 }
 0x10e   :  { %v71_v18 = vpop.permute.xlu0 %70 }
 0x10f   :  { %v73_v19 = vadd.f32 %v71_v18, %v68_v17 }
 0x111   :  { %77 = vrot.lane.b32.xlu1 %v73_v19, %s139_s18 }
 0x183   :  { %v78_v20 = vpop.permute.xlu1 %77 }
 0x184   :  { %81 = vst.msk [vmem:[#allocation2] sm:$0xff] %vm80_vm2, %v78_v20 }
 0x185   :  { %92 = dma.vmem_to_hbm [thread:$0]  %s88_s20, 128, %s90_s23, [#allocation3]  }
 0x186   :  { %137 = dma.done.wait [#allocation3], 128  }
 0x187   :  { %138 = vsyncadd [#allocation3], 4294967168 }
 0x188   :  { %97 = vsyncpa [#allocation3], 1 }

</bundles_post_ra>
